<compile_context>
chip_gen: v6e
topology: v6e:2x2x1
jax: 0.10.0
libtpu: 0.0.40
codegen_flags: <defaults>
</compile_context>

<pallas_src>
import math

import jax
import jax.numpy as jnp
from jax.experimental import pallas as pl
from jax.experimental.pallas import tpu as pltpu

NOISE_STD = 0.001 ** 0.5
_LANE = 128
_PAD_GRAN = 16 * _LANE      # pad HW to a bf16-friendly (16, 128) granularity
_TR_MAX = 256               # max sublane rows per grid step (256*128 f32 = 128 KiB)


# ----------------------------- Pallas kernel --------------------------------
def screenshoot_kernel(tap_ref, w_ref, l_ref, z_ref, n_ref, o_ref):
    # tap_ref: (4, TR, 128) bf16  4 bilinear tap planes of the input image
    # w_ref  : (4, TR, 128) bf16  bilinear weights (0 outside the image)
    # l_ref  : (TR, 128)    f32   light-distortion mask (shared over B and C)
    # z_ref  : (TR, 128)    f32   moire mask * 2 - 1 (shared over B)
    # n_ref  : (TR, 128)    f32   standard-normal noise
    # o_ref  : (TR, 128)    f32   output tile
    taps = tap_ref[...].astype(jnp.float32)
    w = w_ref[...].astype(jnp.float32)
    warped = (w[0] * taps[0] + w[1] * taps[1]
              + w[2] * taps[2] + w[3] * taps[3])      # pure VPU work
    o_ref[...] = (warped * l_ref[...] * 0.85          # light distortion
                  + z_ref[...] * 0.15                 # moire distortion
                  + NOISE_STD * n_ref[...])           # gaussian noise


def _pick_tr(r):
    """Largest multiple of 16 that divides r, capped at _TR_MAX."""
    cap = min(r, _TR_MAX)
    for tr in range(cap - cap % 16, 15, -16):
        if r % tr == 0:
            return tr
    return r  # unreachable: r is always a multiple of 16 here


def _pallas_screenshoot(taps, weights, light, moire, noise):
    B, _, C, R, _ = taps.shape
    TR = _pick_tr(R)
    # channel innermost: weights (b,r) and light (r) blocks stay resident
    grid = (R // TR, B, C)
    return pl.pallas_call(
        screenshoot_kernel,
        out_shape=jax.ShapeDtypeStruct((B, C, R, _LANE), jnp.float32),
        grid_spec=pltpu.PrefetchScalarGridSpec(
            num_scalar_prefetch=0,
            grid=grid,
            in_specs=[
                pl.BlockSpec((None, 4, None, TR, _LANE),
                             lambda r, b, c: (b, 0, c, r, 0)),
                pl.BlockSpec((None, 4, TR, _LANE),
                             lambda r, b, c: (b, 0, r, 0)),
                pl.BlockSpec((TR, _LANE),
                             lambda r, b, c: (r, 0)),
                pl.BlockSpec((None, TR, _LANE),
                             lambda r, b, c: (c, r, 0)),
                pl.BlockSpec((None, None, TR, _LANE),
                             lambda r, b, c: (b, c, r, 0)),
            ],
            out_specs=pl.BlockSpec((None, None, TR, _LANE),
                                   lambda r, b, c: (b, c, r, 0)),
        ),
        compiler_params=pltpu.CompilerParams(
            dimension_semantics=("parallel", "parallel", "parallel")),
    )(taps, weights, light, moire, noise)


# ------------------------- glue: perspective warp ---------------------------
def _get_perspective_transform(src, dst):
    """DLT solve, equivalent to kornia.get_perspective_transform for 4 points."""
    xs, ys = src[:, 0], src[:, 1]
    xd, yd = dst[:, 0], dst[:, 1]
    zeros = jnp.zeros(4, jnp.float32)
    ones = jnp.ones(4, jnp.float32)
    a1 = jnp.stack([xs, ys, ones, zeros, zeros, zeros, -xd * xs, -xd * ys], axis=1)
    a2 = jnp.stack([zeros, zeros, zeros, xs, ys, ones, -yd * xs, -yd * ys], axis=1)
    A = jnp.concatenate([a1, a2], axis=0)               # (8, 8)
    rhs = jnp.concatenate([xd, yd], axis=0)             # (8,)
    h = jnp.linalg.solve(A, rhs)
    return jnp.concatenate([h, jnp.ones(1, jnp.float32)]).reshape(3, 3)


def _perspective_taps(key, B, H, W, d=2.0):
    """Per-batch 4 bilinear tap indices + weights for the random perspective warp.

    Returns idx (B, 4, HW) int32 and w (B, 4, HW) float32 — no dense (HW, HW)
    matrix and no one_hot materialization.
    """
    HW = H * W
    image_size = float(H)   # the reference adds h (= image_size) to both axes
    src = jnp.array([[0.0, 0.0], [W - 1.0, 0.0], [W - 1.0, H - 1.0], [0.0, H - 1.0]],
                    dtype=jnp.float32)
    base_dst = jnp.array([[0.0, 0.0], [image_size, 0.0],
                          [image_size, image_size], [0.0, image_size]],
                         dtype=jnp.float32)
    offs = jax.random.uniform(key, (B, 4, 2), minval=-d, maxval=d, dtype=jnp.float32)
    dst = base_dst[None] + offs
    M = jax.vmap(_get_perspective_transform, in_axes=(None, 0))(src, dst)  # (B,3,3)
    Minv = jnp.linalg.inv(M)

    ys, xs = jnp.meshgrid(jnp.arange(H, dtype=jnp.float32),
                          jnp.arange(W, dtype=jnp.float32), indexing="ij")
    pts = jnp.stack([xs.ravel(), ys.ravel(), jnp.ones(HW, jnp.float32)], axis=0)

    def taps_one(m_inv):
        srcp = m_inv @ pts                               # (3, HW)
        sx = srcp[0] / srcp[2]
        sy = srcp[1] / srcp[2]
        x0 = jnp.floor(sx)
        y0 = jnp.floor(sy)
        x1, y1 = x0 + 1.0, y0 + 1.0
        wx1 = sx - x0
        wx0 = 1.0 - wx1
        wy1 = sy - y0
        wy0 = 1.0 - wy1

        def one(xi, yi, wv):
            # zero padding outside the image (kornia padding_mode='zeros')
            valid = (xi >= 0) & (xi <= W - 1) & (yi >= 0) & (yi <= H - 1)
            idx = jnp.clip(yi.astype(jnp.int32) * W + xi.astype(jnp.int32), 0, HW - 1)
            return idx, wv * valid.astype(jnp.float32)

        pairs = [one(x0, y0, wx0 * wy0), one(x1, y0, wx1 * wy0),
                 one(x0, y1, wx0 * wy1), one(x1, y1, wx1 * wy1)]
        idx = jnp.stack([p[0] for p in pairs], axis=0)   # (4, HW)
        wgt = jnp.stack([p[1] for p in pairs], axis=0)   # (4, HW)
        return idx, wgt

    return jax.vmap(taps_one)(Minv)                       # (B,4,HW), (B,4,HW)


# ----------------------- glue: light / moire masks --------------------------
def _light_distortion(key, c, H, W):
    """Single (H, W) plane — the reference mask is identical across B and C."""
    k1, k2, k3, k4, k5 = jax.random.split(key, 5)
    a = 0.7 + jax.random.uniform(k1) * 0.2
    b = 1.1 + jax.random.uniform(k2) * 0.2
    # c == 0: linear ramp (the reference mixes H and W exactly like this)
    i = jnp.arange(H, dtype=jnp.float32)[:, None]
    ramp = -((b - a) / (H - 1)) * (i - W) + a
    ramp = jnp.broadcast_to(ramp, (H, W))
    direction = jax.random.randint(k3, (), 1, 5)
    # reference collapses directions 2/3/4 to the same single rot90
    L0 = jnp.where(direction == 1, ramp, jnp.rot90(ramp, 1))
    # c == 1: radial falloff (255 hard-coded, exactly as in the reference)
    x = jax.random.randint(k4, (), 0, H).astype(jnp.float32)
    y = jax.random.randint(k5, (), 0, W).astype(jnp.float32)
    max_len = jnp.max(jnp.stack([
        jnp.sqrt(x ** 2 + y ** 2),
        jnp.sqrt((x - 255.0) ** 2 + y ** 2),
        jnp.sqrt(x ** 2 + (y - 255.0) ** 2),
        jnp.sqrt((x - 255.0) ** 2 + (y - 255.0) ** 2)]))
    ii = jnp.arange(H, dtype=jnp.float32)[:, None]
    jj = jnp.arange(W, dtype=jnp.float32)[None, :]
    radial = jnp.sqrt((ii - x) ** 2 + (jj - y) ** 2) / max_len * (a - b) + b
    return jnp.where(c == 0, L0, radial).astype(jnp.float32)      # (H, W)


def _moire_distortion(key, C, H, W):
    """(C, H, W) plane — the reference mask is identical across the batch."""
    Z = jnp.zeros((C, H, W), jnp.float32)
    ii = jnp.arange(H, dtype=jnp.float32)[:, None]
    jj = jnp.arange(W, dtype=jnp.float32)[None, :]
    for ch in range(min(3, C)):
        k1, k2, k3, key = jax.random.split(key, 4)
        theta = jax.random.randint(k1, (), 0, 180).astype(jnp.float32)
        cx = jax.random.uniform(k2) * H
        cy = jax.random.uniform(k3) * W
        z1 = 0.5 + 0.5 * jnp.cos(2.0 * math.pi * jnp.sqrt((ii + 1 - cx) ** 2
                                                          + (jj + 1 - cy) ** 2))
        z2 = 0.5 + 0.5 * jnp.cos(jnp.cos(theta / 180.0 * math.pi) * (jj + 1)
                                 + jnp.sin(theta / 180.0 * math.pi) * (ii + 1))
        M = (jnp.minimum(z1, z2) + 1.0) / 2.0
        Z = Z.at[ch].set(M)
    return Z


# ------------------------------ forward pass ---------------------------------
def screen_shooting(embed_image, key):
    B, C, H, W = embed_image.shape
    HW = H * W
    HWp = ((HW + _PAD_GRAN - 1) // _PAD_GRAN) * _PAD_GRAN   # lane/sublane aligned
    R = HWp // _LANE
    pad = HWp - HW
    k_persp, k_c, k_light, k_moire, k_noise = jax.random.split(key, 5)

    # perspective warp as 4 bilinear taps per output pixel
    idx, wgt = _perspective_taps(k_persp, B, H, W, d=2.0)   # (B,4,HW) each
    # gather the 4 tap planes directly in bf16 (dominant HBM stream)
    x_flat = embed_image.astype(jnp.bfloat16).reshape(B, C, HW)
    gather_one = lambda xb, ib: jnp.moveaxis(jnp.take(xb, ib, axis=1), 1, 0)
    taps = jax.vmap(gather_one)(x_flat, idx)                # (B, 4, C, HW) bf16
    taps = jnp.pad(taps, ((0, 0), (0, 0), (0, 0), (0, pad)))
    taps = taps.reshape(B, 4, C, R, _LANE)
    wgt = jnp.pad(wgt, ((0, 0), (0, 0), (0, pad))).astype(jnp.bfloat16)
    wgt = wgt.reshape(B, 4, R, _LANE)

    c = jax.random.randint(k_c, (), 0, 2)
    light = _light_distortion(k_light, c, H, W).reshape(HW)
    light = jnp.pad(light, (0, pad)).reshape(R, _LANE)                     # (R,128)
    moire = (_moire_distortion(k_moire, C, H, W) * 2.0 - 1.0).reshape(C, HW)
    moire = jnp.pad(moire, ((0, 0), (0, pad))).reshape(C, R, _LANE)        # (C,R,128)

    noise = jax.random.normal(k_noise, (B, C, R, _LANE), dtype=jnp.float32)

    out = _pallas_screenshoot(taps, wgt, light, moire, noise)   # (B,C,R,128)
    out = out.reshape(B, C, HWp)[:, :, :HW].reshape(B, C, H, W)
    return out


if __name__ == "__main__":
    key = jax.random.PRNGKey(0)
    k_img, k_fwd = jax.random.split(key)
    B, C, H, W = 2, 3, 16, 16
    x = jax.random.uniform(k_img, (B, C, H, W), dtype=jnp.float32)

    out = screen_shooting(x, k_fwd)
    jax.block_until_ready(out)
    assert out.shape == (B, C, H, W) and out.dtype == jnp.float32
    assert bool(jnp.all(jnp.isfinite(out)))
    print("KERNEL_OK")
</pallas_src>

<mosaic_0001>
module attributes {stable_mosaic.version = 11 : i64} {
  func.func @screenshoot_kernel(%arg0: i32, %arg1: i32, %arg2: i32, %arg3: memref<1x4x1x16x128xbf16, #tpu.memory_space<vmem>>, %arg4: memref<1x4x16x128xbf16, #tpu.memory_space<vmem>>, %arg5: memref<16x128xf32, #tpu.memory_space<vmem>>, %arg6: memref<1x16x128xf32, #tpu.memory_space<vmem>>, %arg7: memref<1x1x16x128xf32, #tpu.memory_space<vmem>>, %arg8: memref<1x1x16x128xf32, #tpu.memory_space<vmem>>) attributes {dimension_semantics = [#tpu.dimension_semantics<parallel>, #tpu.dimension_semantics<parallel>, #tpu.dimension_semantics<parallel>], iteration_bounds = array<i64: 1, 2, 3>, scalar_prefetch = 0 : i64, scratch_operands = 0 : i64, tpu.core_type = #tpu.core_type<tc>, window_params = [{transform_indices = @transform_0, window_bounds = array<i64: 1, 4, 1, 16, 128>}, {transform_indices = @transform_1, window_bounds = array<i64: 1, 4, 16, 128>}, {transform_indices = @transform_2, window_bounds = array<i64: 16, 128>}, {transform_indices = @transform_3, window_bounds = array<i64: 1, 16, 128>}, {transform_indices = @transform_4, window_bounds = array<i64: 1, 1, 16, 128>}, {transform_indices = @transform_5, window_bounds = array<i64: 1, 1, 16, 128>}]} {
    %c0 = arith.constant 0 : index
    %c0_0 = arith.constant 0 : index
    %c0_1 = arith.constant 0 : index
    %c0_2 = arith.constant 0 : index
    %c0_3 = arith.constant 0 : index
    %0 = vector.load %arg3[%c0, %c0_0, %c0_1, %c0_2, %c0_3] : memref<1x4x1x16x128xbf16, #tpu.memory_space<vmem>>, vector<1x4x1x16x128xbf16>
    %1 = vector.shape_cast %0 : vector<1x4x1x16x128xbf16> to vector<4x16x128xbf16>
    %2 = arith.extf %1 : vector<4x16x128xbf16> to vector<4x16x128xf32>
    %c0_4 = arith.constant 0 : index
    %c0_5 = arith.constant 0 : index
    %c0_6 = arith.constant 0 : index
    %c0_7 = arith.constant 0 : index
    %3 = vector.load %arg4[%c0_4, %c0_5, %c0_6, %c0_7] : memref<1x4x16x128xbf16, #tpu.memory_space<vmem>>, vector<1x4x16x128xbf16>
    %4 = vector.shape_cast %3 : vector<1x4x16x128xbf16> to vector<4x16x128xbf16>
    %5 = arith.extf %4 : vector<4x16x128xbf16> to vector<4x16x128xf32>
    %6 = vector.extract_strided_slice %5 {offsets = [0, 0, 0], sizes = [1, 16, 128], strides = [1, 1, 1]} : vector<4x16x128xf32> to vector<1x16x128xf32>
    %7 = vector.shape_cast %6 : vector<1x16x128xf32> to vector<16x128xf32>
    %8 = vector.extract_strided_slice %2 {offsets = [0, 0, 0], sizes = [1, 16, 128], strides = [1, 1, 1]} : vector<4x16x128xf32> to vector<1x16x128xf32>
    %9 = vector.shape_cast %8 : vector<1x16x128xf32> to vector<16x128xf32>
    %10 = arith.mulf %7, %9 : vector<16x128xf32>
    %11 = vector.extract_strided_slice %5 {offsets = [1, 0, 0], sizes = [1, 16, 128], strides = [1, 1, 1]} : vector<4x16x128xf32> to vector<1x16x128xf32>
    %12 = vector.shape_cast %11 : vector<1x16x128xf32> to vector<16x128xf32>
    %13 = vector.extract_strided_slice %2 {offsets = [1, 0, 0], sizes = [1, 16, 128], strides = [1, 1, 1]} : vector<4x16x128xf32> to vector<1x16x128xf32>
    %14 = vector.shape_cast %13 : vector<1x16x128xf32> to vector<16x128xf32>
    %15 = arith.mulf %12, %14 : vector<16x128xf32>
    %16 = arith.addf %10, %15 : vector<16x128xf32>
    %17 = vector.extract_strided_slice %5 {offsets = [2, 0, 0], sizes = [1, 16, 128], strides = [1, 1, 1]} : vector<4x16x128xf32> to vector<1x16x128xf32>
    %18 = vector.shape_cast %17 : vector<1x16x128xf32> to vector<16x128xf32>
    %19 = vector.extract_strided_slice %2 {offsets = [2, 0, 0], sizes = [1, 16, 128], strides = [1, 1, 1]} : vector<4x16x128xf32> to vector<1x16x128xf32>
    %20 = vector.shape_cast %19 : vector<1x16x128xf32> to vector<16x128xf32>
    %21 = arith.mulf %18, %20 : vector<16x128xf32>
    %22 = arith.addf %16, %21 : vector<16x128xf32>
    %23 = vector.extract_strided_slice %5 {offsets = [3, 0, 0], sizes = [1, 16, 128], strides = [1, 1, 1]} : vector<4x16x128xf32> to vector<1x16x128xf32>
    %24 = vector.shape_cast %23 : vector<1x16x128xf32> to vector<16x128xf32>
    %25 = vector.extract_strided_slice %2 {offsets = [3, 0, 0], sizes = [1, 16, 128], strides = [1, 1, 1]} : vector<4x16x128xf32> to vector<1x16x128xf32>
    %26 = vector.shape_cast %25 : vector<1x16x128xf32> to vector<16x128xf32>
    %27 = arith.mulf %24, %26 : vector<16x128xf32>
    %28 = arith.addf %22, %27 : vector<16x128xf32>
    %c0_8 = arith.constant 0 : index
    %c0_9 = arith.constant 0 : index
    %29 = vector.load %arg5[%c0_8, %c0_9] : memref<16x128xf32, #tpu.memory_space<vmem>>, vector<16x128xf32>
    %30 = arith.mulf %28, %29 : vector<16x128xf32>
    %cst = arith.constant 8.500000e-01 : f32
    %31 = vector.broadcast %cst : f32 to vector<16x128xf32>
    %32 = arith.mulf %30, %31 : vector<16x128xf32>
    %c0_10 = arith.constant 0 : index
    %c0_11 = arith.constant 0 : index
    %c0_12 = arith.constant 0 : index
    %33 = vector.load %arg6[%c0_10, %c0_11, %c0_12] : memref<1x16x128xf32, #tpu.memory_space<vmem>>, vector<1x16x128xf32>
    %34 = vector.shape_cast %33 : vector<1x16x128xf32> to vector<16x128xf32>
    %cst_13 = arith.constant 1.500000e-01 : f32
    %35 = vector.broadcast %cst_13 : f32 to vector<16x128xf32>
    %36 = arith.mulf %34, %35 : vector<16x128xf32>
    %37 = arith.addf %32, %36 : vector<16x128xf32>
    %c0_14 = arith.constant 0 : index
    %c0_15 = arith.constant 0 : index
    %c0_16 = arith.constant 0 : index
    %c0_17 = arith.constant 0 : index
    %38 = vector.load %arg7[%c0_14, %c0_15, %c0_16, %c0_17] : memref<1x1x16x128xf32, #tpu.memory_space<vmem>>, vector<1x1x16x128xf32>
    %39 = vector.shape_cast %38 : vector<1x1x16x128xf32> to vector<16x128xf32>
    %cst_18 = arith.constant 0.0316227749 : f32
    %40 = vector.broadcast %cst_18 : f32 to vector<16x128xf32>
    %41 = arith.mulf %40, %39 : vector<16x128xf32>
    %42 = arith.addf %37, %41 : vector<16x128xf32>
    %c0_19 = arith.constant 0 : index
    %c0_20 = arith.constant 0 : index
    %c0_21 = arith.constant 0 : index
    %c0_22 = arith.constant 0 : index
    %43 = vector.load %arg8[%c0_19, %c0_20, %c0_21, %c0_22] : memref<1x1x16x128xf32, #tpu.memory_space<vmem>>, vector<1x1x16x128xf32>
    %44 = vector.shape_cast %43 : vector<1x1x16x128xf32> to vector<16x128xf32>
    %45 = vector.shape_cast %42 : vector<16x128xf32> to vector<1x1x16x128xf32>
    tpu.vector_store %arg8[%c0_19, %c0_20, %c0_21, %c0_22], %45 {strides = array<i32>} : memref<1x1x16x128xf32, #tpu.memory_space<vmem>>, vector<1x1x16x128xf32>,
    return
  }
  func.func @transform_0(%arg0: i32, %arg1: i32, %arg2: i32) -> (i32, i32, i32, i32, i32) {
    %c0_i32 = arith.constant 0 : i32
    %c0_i32_0 = arith.constant 0 : i32
    %c0_i32_1 = arith.constant 0 : i32
    return %arg1, %c0_i32, %arg2, %arg0, %c0_i32_0 : i32, i32, i32, i32, i32
  }
  func.func @transform_1(%arg0: i32, %arg1: i32, %arg2: i32) -> (i32, i32, i32, i32) {
    %c0_i32 = arith.constant 0 : i32
    %c0_i32_0 = arith.constant 0 : i32
    %c0_i32_1 = arith.constant 0 : i32
    return %arg1, %c0_i32, %arg0, %c0_i32_0 : i32, i32, i32, i32
  }
  func.func @transform_2(%arg0: i32, %arg1: i32, %arg2: i32) -> (i32, i32) {
    %c0_i32 = arith.constant 0 : i32
    %c0_i32_0 = arith.constant 0 : i32
    return %arg0, %c0_i32 : i32, i32
  }
  func.func @transform_3(%arg0: i32, %arg1: i32, %arg2: i32) -> (i32, i32, i32) {
    %c0_i32 = arith.constant 0 : i32
    %c0_i32_0 = arith.constant 0 : i32
    return %arg2, %arg0, %c0_i32 : i32, i32, i32
  }
  func.func @transform_4(%arg0: i32, %arg1: i32, %arg2: i32) -> (i32, i32, i32, i32) {
    %c0_i32 = arith.constant 0 : i32
    %c0_i32_0 = arith.constant 0 : i32
    return %arg1, %arg2, %arg0, %c0_i32 : i32, i32, i32, i32
  }
  func.func @transform_5(%arg0: i32, %arg1: i32, %arg2: i32) -> (i32, i32, i32, i32) {
    %c0_i32 = arith.constant 0 : i32
    %c0_i32_0 = arith.constant 0 : i32
    return %arg1, %arg2, %arg0, %c0_i32 : i32, i32, i32, i32
  }
}

</mosaic_0001>

<bundles_post_ra>
// kernel: tpu_custom_call.1
= control target key start
LH: loop header
LB: loop body
LE: loop exit
PB: predicated region body
PF: predicated region fallthrough
CT: control target
= control target key end

     0   :  { %s1684_s0 = inlined_call_operand.hbm [shape: bf16[2,4,3,16,128], index: 0, kind: input, shape index: {}]   ;;  %s1685_s1 = inlined_call_operand.hbm [shape: bf16[2,4,16,128], index: 1, kind: input, shape index: {}]   ;;  %s1686_s2 = inlined_call_operand.hbm [shape: f32[16,128], index: 2, kind: input, shape index: {}]   ;;  %s1687_s3 = inlined_call_operand.hbm [shape: f32[3,16,128], index: 3, kind: input, shape index: {}]   ;;  %s1688_s4 = inlined_call_operand.hbm [shape: f32[2,3,16,128], index: 4, kind: input, shape index: {}]   ;;  %s1689_s5 = inlined_call_operand.hbm [shape: f32[2,3,16,128], index: 5, kind: output, shape index: {}]  }
   0x1   :  { %1716 = sst [smem:[#allocation37_spill]] %s1684_s0 }
   0x2   :  { %1717 = sst [smem:[#allocation38_spill]] %s1686_s2 }
   0x3   :  { %1718 = sst [smem:[#allocation39_spill]] %s1687_s3 }
   0x4   :  { %1719 = sst [smem:[#allocation40_spill]] %s1689_s5 }
   0x5   :  { %10 = vsyncpa [#allocation3], 0 }
   0x6   :  { %12 = vsyncpa [#allocation3 + $0x1], 0 }
   0x7   :  { %13 = vsyncpa [#allocation6], 0 }
   0x8   :  { %15 = vsyncpa [#allocation6 + $0x1], 0 }
   0x9   :  { %16 = vsyncpa [#allocation9], 0 }
   0xa   :  { %18 = vsyncpa [#allocation9 + $0x1], 0 }
   0xb   :  { %19 = vsyncpa [#allocation4], 0 }
   0xc   :  { %21 = vsyncpa [#allocation4 + $0x1], 0  ;;  %s1298_s18 = smov 0   ;;  %s1300_s19 = smov 0  }
   0xd   :  { %s1302_s20 = smov 0   ;;  %s1304_s21 = smov 0  }
   0xe   :  { %s1306_s22 = smov 0   ;;  %s1308_s23 = smov 0  }
   0xf   :  { %s1310_s24 = smov 0   ;;  %s1312_s25 = smov 0  }
  0x10   :  { %s1314_s26 = smov 0   ;;  %s1316_s27 = smov 0  }
  0x11   :  { %s1318_s28 = smov 0   ;;  %s1320_s29 = smov 0  }
  0x12   :  { %s1322_s30 = smov 0   ;;  %s1324_s6 = smov 0  }
  0x13 LB: > { %1720 = sst [smem:[#allocation21_spill]] %s1198_s19  ;;  %s1369_s7 = sadd.s32 4294967295, %s1246_s6   ;;  %s1246_s6 = sphi %s1324_s6, %s27_s6   ;;  %s1242_s30 = sphi %s1322_s30, %s1789_s30   ;;  %s1238_s29 = sphi %s1320_s29, %s1788_s29   ;;  %s1234_s28 = sphi %s1318_s28, %s1787_s28   ;;  %s1230_s27 = sphi %s1316_s27, %s1786_s27   ;;  %s1226_s26 = sphi %s1314_s26, %s1779_s26   ;;  %s1222_s25 = sphi %s1312_s25, %s1785_s25   ;;  %s1218_s24 = sphi %s1310_s24, %s1784_s24   ;;  %s1214_s23 = sphi %s1308_s23, %s1783_s23   ;;  %s1210_s22 = sphi %s1306_s22, %s1782_s22   ;;  %s1206_s21 = sphi %s1304_s21, %s1776_s21   ;;  %s1202_s20 = sphi %s1302_s20, %s1775_s20   ;;  %s1198_s19 = sphi %s1300_s19, %s1774_s19   ;;  %s1194_s18 = sphi %s1298_s18, %s1773_s18  }
  0x14   : > { %1721 = sst [smem:[#allocation22_spill]] %s1202_s20  ;;  %s39_s9 = sadd.s32 1, %s1238_s29 }
  0x15   : > { %1722 = sst [smem:[#allocation23_spill]] %s1210_s22  ;;  %s42_s10 = sadd.s32 1, %s1242_s30 }
  0x16   : > { %1723 = sst [smem:[#allocation24_spill]] %s1218_s24  ;;  %p40_p0 = scmp.ge.s32.totalorder %s39_s9, 3 }
  0x17   : > { %1724 = sst [smem:[#allocation25_spill]] %s1226_s26  ;;  %s57_s11 = sadd.s32 1, %s1226_s26 }
  0x18   : > { %1725 = sst [smem:[#allocation26_spill]] %s1230_s27  ;;  %p1694_p1 = scmp.ne.s32.totalorder %s1226_s26, %s1222_s25 }
  0x19   : > { %1726 = sst [smem:[#allocation27_spill]] %s1234_s28  ;;  %p65_p2 = scmp.eq.s32.totalorder %s1246_s6, 0 }
  0x1a   : > { %s1791_s9 = smov (%p40_p0, %s39_s9), 0  ;;  %s1793_s10 = smov (!%p40_p0, %s42_s10), %s1242_s30 }
  0x1b   : > { %1727 = sst [smem:[#allocation28_spill]] %s1791_s9  ;;  %s51_s12 = ssub.s32 %s1238_s29, %s1791_s9 }
  0x1c   : > { %p1388_p3 = por %p65_p2, %p1694_p1  ;;  %p44_p4 = scmp.ge.s32.totalorder %s1793_s10, 2 }
  0x1d   : > { %p1693_p5 = scmp.ne.s32.totalorder %s1222_s25, %s1218_s24  ;;  %p71_p6 = scmp.eq.s32.totalorder %s1369_s7, 0 }
  0x1e   : > { %s85_s14 = sadd.s32 1, %s1214_s23  ;;  %s1795_s10 = smov (%p44_p4, %s1793_s10), 0 }
  0x1f   : > { %1729 = sst [smem:[#allocation29_spill]] %s1795_s10  ;;  %p1403_p7 = por %p71_p6, %p1693_p5 }
  0x20   : > { %p92_p8 = scmp.ne.s32.totalorder %s1214_s23, %s1210_s22  ;;  %s50_s16 = ssub.s32 %s1242_s30, %s1795_s10 }
  0x21   : > { %s1730_s15 = scalar_select %p1403_p7, 1, 0 }
  0x22   : > { %p98_p9 = scmp.ne.s32.totalorder %s1210_s22, %s1206_s21  ;;  %s52_s17 = sor.u32 %s51_s12, %s50_s16 }
  0x23   : > { %p83_p10 = scmp.eq.s32.totalorder %s50_s16, 0  ;;  %p55_p11 = scmp.eq.s32.totalorder %s52_s17, 0 }
  0x24   : > { %p1415_p12 = por %p92_p8, %p65_p2  ;;  %p1427_p13 = por %p98_p9, %p71_p6 }
  0x25   : > { %s1420_s9 = scalar_select %p83_p10, %s1214_s23, %s85_s14  }
  0x26   : > { %s1731_s8 = scalar_select %p1415_p12, 1, 0 }
  0x27   : > { %1732 = sst [smem:[#allocation30_spill]] %s1420_s9  ;;  %p137_p0 = scmp.eq.s32.totalorder %s51_s12, 0 }
  0x28   : > { %s1423_s10 = scalar_select %p55_p11, %s1226_s26, %s57_s11  }
  0x29   : > { %s1734_s21 = scalar_select %p1427_p13, 1, 0 }
  0x2a   : > { %1733 = sst [smem:[#allocation31_spill]] %s1423_s10  ;;  %s139_s16 = sadd.s32 1, %s1202_s20 }
  0x2b   : > { %1735 = sst [smem:[#allocation32_spill]] %s1734_s21  ;;  %p146_p4 = scmp.ne.s32.totalorder %s1202_s20, %s1198_s19 }
  0x2c   : > { %s1435_s17 = scalar_select %p137_p0, %s1202_s20, %s139_s16  }
  0x2d   : > { %p1439_p8 = por %p146_p4, %p65_p2  ;;  %p152_p10 = scmp.ne.s32.totalorder %s1198_s19, %s1194_s18 }
  0x2e   : > { %1736 = sst [smem:[#allocation33_spill]] %s1435_s17  ;;  %p210_p5 = scmp.eq.s32.totalorder %s1369_s7, 5 }
  0x2f   : > { %s1737_s5 = scalar_select %p1439_p8, 1, 0 }
  0x30   : > { %s1738_s11 = sadd.s32 4294967294, %s1246_s6   ;;  %p1450_p9 = por %p152_p10, %p71_p6 }
  0x31   : > { %p216_p11 = scmp.eq.s32.totalorder %s1738_s11, 5  ;;  %p731_p1 = scmp.ge.s32.totalorder %s1246_s6, 1 }
  0x32   : > { %s1739_s14 = scalar_select %p1450_p9, 1, 0 }
  0x33   : > { %p1741_p13 = scmp.ne.s32.totalorder %s1226_s26, %s1222_s25  ;;  %p1744_p0 = scmp.ne.s32.totalorder %s1222_s25, %s1218_s24 }
  0x34   : > { %1740 = sst [smem:[#allocation34_spill]] %s1739_s14  ;;  %p223_p4 = scmp.lt.s32.totalorder %s1246_s6, 7 }
  0x35   : > { %p1458_p7 = por %p210_p5, %p1741_p13  ;;  %p1465_p2 = por %p216_p11, %p1744_p0 }
  0x36   : > { %p1470_p12 = pnand %p731_p1, %p223_p4  ;;  %s1248_s11 = smov [#allocation7]  }
  0x37   : > { %s1742_s12 = scalar_select %p1458_p7, 1, 0 }
  0x38   : > { %s1745_s16 = scalar_select %p1465_p2, 1, 0 }
  0x39   : > { %1743 = sst [smem:[#allocation35_spill]] %s1742_s12  ;;  %s238_s10 = sshll.u32 %s1248_s11, 4  ;;  %s239_s10 = int_to_ptr.vmem [resolvable:$true] %s238_s10 }
  0x3a   : > { %1746 = sst [smem:[#allocation36_spill]] %s1745_s16  ;;  %p824_p10 = pneg %p1470_p12 }
  0x3b   : > { %s973_s9 = scalar_lea.vmem %s239_s10, 256  ;;  %p981_p9 = scmp.lt.s32.totalorder %s239_s10, %s239_s10 }
  0x3c   : > { %p825_p5 = pnand %p824_p10, %p71_p6  ;;  %p974_p7 = scmp.ne.s32.totalorder %s239_s10, %s973_s9 }
  0x3d   : > { %p982_p2 = scmp.lt.s32.totalorder %s973_s9, %s973_s9 }
  0x3e   : > { %p964_p13 = pneg %p825_p5 }
  0x3f   : > { %p983_p8 = por %p982_p2, %p981_p9 }
  0x40   : > { %p976_p11 = pnand %p974_p7, %p964_p13 }
  0x42   : > { %p977_p0 = pneg %p976_p11 }
  0x44   : > { %p984_p1 = pnand %p983_p8, %p977_p0 }
  0x46   : > { %987 = shalt.err (!%p984_p1)
}
  0x47   : > { %s1249_s17 = smov 128   ;;  %s1250_s16 = smov 8  }
  0x48   : > { %s1748_s2 = sld [smem:[#allocation38_spill]]  ;;  %p733_p4 = scmp.ge.s32.totalorder %s1246_s6, 6 }
  0x4a   : > { %248 = sbr.rel (%p733_p4) target bundleno = 145 (0x91), region = 20 }
  0x4e   : > { %827 = dma.hbm_to_vmem [thread:$0]  (!%p825_p5), %s1748_s2, 256, %s239_s10, [#allocation6], %s1249_s17, %s1249_s17, %s1250_s16  }
  0x4f   : > { %s1483_s9 = sand.u32 1, %s1226_s26   ;;  %s1712_s11 = sshll.u32 %s1238_s29, 1 }
  0x50   : > { %s734_s27 = sshll.u32 %s1483_s9, 5  ;;  %s800_s28 = smul.u32 24, %s1242_s30 }
  0x51   : > { %s805_s24 = scalar_select %p1388_p3, [#allocation0], [#allocation14] }
  0x52   : > { %s264_s10 = sadd.s32 %s800_s28, %s1712_s11  ;;  %s256_s17 = scalar_lea.vmem [#allocation2], %s734_s27 }
  0x53   : > { %s279_s12 = sshll.u32 %s256_s17, 4  ;;  %s736_s16 = sshll.u32 %s264_s10, 6  ;;  %s280_s12 = int_to_ptr.vmem [resolvable:$true] %s279_s12 }
  0x54   : > { %s271_s2 = sld [smem:[%s805_s24]]   ;;  %s1251_s21 = smov 384  }
  0x55   : > { %s1749_s0 = sld [smem:[#allocation37_spill]]  ;;  %s1252_s22 = smov 128  }
  0x56   : > { %806 = sst [smem:[#allocation13]] (%p1388_p3), %s1251_s21  ;;  %s1253_s28 = smov 2  }
  0x57   : > { %807 = sst [smem:[#allocation13 + $0x1]] (%p1388_p3), %s1252_s22  ;;  %s1254_s10 = smov 64  }
  0x58   : > { %808 = sst [smem:[#allocation13 + $0x2]] (%p1388_p3), %s1253_s28  ;;  %s1255_s19 = smov 4  }
  0x59   : > { %809 = sst [smem:[#allocation13 + $0x3]] (%p1388_p3), %s1254_s10  ;;  %s253_s14 = scalar_lea.sflag [#allocation3], %s1483_s9 }
  0x5a   : > { %s737_s27 = sshll.u32 %s271_s2, 26  ;;  %810 = sst [smem:[#allocation13 + $0x4]] (%p1388_p3), %s1254_s10 }
  0x5b   : > { %s266_s26 = scalar_lea.hbm %s1749_s0, %s736_s16  ;;  %s738_s24 = sadd.s32 134217728, %s737_s27 }
  0x5c   : > { %811 = sst [smem:[#allocation13 + $0x5]] (%p1388_p3), %s1255_s19  ;;  %s1256_s17 = smov 131072  }
  0x5d   : > { %812 = dma.general (%p1388_p3), %s266_s26, 512, %s280_s12, %s253_s14, %s1256_s17, [#allocation13], %s738_s24, 0  }
  0x5e   : > { %s302_s22 = sand.u32 1, %s1246_s6   ;;  %s327_s2 = sand.u32 1, %s1202_s20  }
  0x5f   : > { %s742_s21 = sshll.u32 %s327_s2, 4  ;;  %s761_s16 = sshll.u32 %s1238_s29, 8 }
  0x60   : > { %s1750_s3 = sld [smem:[#allocation39_spill]]  ;;  %s329_s11 = scalar_lea.vmem [#allocation8], %s742_s21 }
  0x61   : > { %s338_s0 = sshll.u32 %s329_s11, 4  ;;  %s1518_s19 = scalar_lea.sflag [#allocation9], %s302_s22  ;;  %s339_s0 = int_to_ptr.vmem [resolvable:$true] %s338_s0 }
  0x62   : > { %s1000_s26 = scalar_lea.vmem %s339_s0, 256  ;;  %p1751_p8 = scmp.ne.s32.totalorder %s1737_s5, 0 }
  0x63   : > { %p1001_p7 = scmp.ne.s32.totalorder %s339_s0, %s1000_s26  ;;  %s1257_s12 = smov [#allocation8]  }
  0x64   : > { %s1004_s24 = sshll.u32 %s1257_s12, 4  ;;  %s1005_s24 = int_to_ptr.vmem [resolvable:$false] %s1004_s24 }
  0x65   : > { %p1002_p9 = pnand %p1001_p7, %p1751_p8  ;;  %s1006_s14 = scalar_lea.vmem %s1005_s24, 512 }
  0x66   : > { %s337_s10 = scalar_lea.hbm %s1750_s3, %s761_s16  ;;  %p1007_p10 = scmp.lt.s32.totalorder %s339_s0, %s1005_s24 }
  0x67   : > { %p1003_p2 = pneg %p1002_p9  ;;  %p1008_p5 = scmp.lt.s32.totalorder %s1006_s14, %s1000_s26 }
  0x69   : > { %p1009_p13 = por %p1008_p5, %p1007_p10 }
  0x6b   : > { %p1010_p11 = pnand %p1009_p13, %p1003_p2 }
  0x6d   : > { %1013 = shalt.err (!%p1010_p11)
}
  0x6e   : > { %s1714_s17 = smov 128   ;;  %s1715_s11 = smov 8  }
  0x6f   : > { %814 = dma.hbm_to_vmem [thread:$0]  (%p1751_p8), %s337_s10, 256, %s339_s0, %s1518_s19, %s1714_s17, %s1714_s17, %s1715_s11  }
  0x70   : > { %s304_s2 = sand.u32 1, %s1214_s23   ;;  %s760_s21 = sshll.u32 %s1242_s30, 9 }
  0x71   : > { %s739_s16 = sshll.u32 %s304_s2, 5  ;;  %s314_s26 = scalar_lea.hbm %s1685_s1, %s760_s21 }
  0x72   : > { %s306_s12 = scalar_lea.vmem [#allocation5], %s739_s16  ;;  %s745_s14 = sshll.u32 %s1483_s9, 4 }
  0x73   : > { %s315_s24 = sshll.u32 %s306_s12, 4  ;;  %s303_s3 = scalar_lea.sflag [#allocation6], %s302_s22  ;;  %s316_s24 = int_to_ptr.vmem [resolvable:$true] %s315_s24 }
  0x74   : > { %s1026_s20 = scalar_lea.vmem %s316_s24, 512  ;;  %p1752_p1 = scmp.ne.s32.totalorder %s1731_s8, 0 }
  0x75   : > { %p1027_p0 = scmp.ne.s32.totalorder %s316_s24, %s1026_s20  ;;  %s1260_s5 = smov [#allocation5]  }
  0x76   : > { %s1030_s0 = sshll.u32 %s1260_s5, 4  ;;  %s1031_s0 = int_to_ptr.vmem [resolvable:$false] %s1030_s0 }
  0x77   : > { %p1028_p4 = pnand %p1027_p0, %p1752_p1  ;;  %s1032_s10 = scalar_lea.vmem %s1031_s0, 1024 }
  0x78   : > { %p1033_p8 = scmp.lt.s32.totalorder %s316_s24, %s1031_s0  ;;  %p1034_p9 = scmp.lt.s32.totalorder %s1032_s10, %s1026_s20 }
  0x79   : > { %p1029_p7 = pneg %p1028_p4 }
  0x7a   : > { %p1035_p2 = por %p1034_p9, %p1033_p8 }
  0x7c   : > { %p1036_p10 = pnand %p1035_p2, %p1029_p7 }
  0x7e   : > { %1039 = shalt.err (!%p1036_p10)
}
  0x7f   : > { %s1261_s2 = smov 64   ;;  %s1262_s9 = smov 4  }
  0x80   : > { %813 = dma.hbm_to_vmem [thread:$0]  (%p1752_p1), %s314_s26, 512, %s316_s24, %s303_s3, %s1261_s2, %s1261_s2, %s1262_s9  }
  0x81   : > { %s801_s22 = smul.u32 6, %s1242_s30  ;;  %s352_s21 = scalar_lea.vmem [#allocation10], %s745_s14 }
  0x82   : > { %s363_s16 = sshll.u32 %s352_s21, 4  ;;  %s1753_s28 = sshll.u32 %s1238_s29, 1  ;;  %s364_s16 = int_to_ptr.vmem [resolvable:$true] %s363_s16 }
  0x83   : > { %s360_s27 = sadd.s32 %s801_s22, %s1753_s28  ;;  %s1052_s10 = scalar_lea.vmem %s364_s16, 256 }
  0x84   : > { %s747_s12 = sshll.u32 %s360_s27, 7  ;;  %p1053_p5 = scmp.ne.s32.totalorder %s364_s16, %s1052_s10 }
  0x85   : > { %s362_s0 = scalar_lea.hbm %s1688_s4, %s747_s12  ;;  %s1263_s17 = smov [#allocation10]  }
  0x86   : > { %p1054_p13 = pnand %p1053_p5, %p1388_p3  ;;  %s1056_s11 = sshll.u32 %s1263_s17, 4  ;;  %s1057_s11 = int_to_ptr.vmem [resolvable:$false] %s1056_s11 }
  0x87   : > { %s1058_s3 = scalar_lea.vmem %s1057_s11, 512  ;;  %p1059_p0 = scmp.lt.s32.totalorder %s364_s16, %s1057_s11 }
  0x88   : > { %p1055_p11 = pneg %p1054_p13  ;;  %p1060_p1 = scmp.lt.s32.totalorder %s1058_s3, %s1052_s10 }
  0x8a   : > { %p1061_p4 = por %p1060_p1, %p1059_p0 }
  0x8c   : > { %p1062_p7 = pnand %p1061_p4, %p1055_p11 }
  0x8e   : > { %1065 = shalt.err (!%p1062_p7)
}
  0x8f   : > { %s1754_s8 = smov 8   ;;  %s1755_s26 = smov 128  }
  0x90   : > { %815 = dma.hbm_to_vmem [thread:$0]  (%p1388_p3), %s362_s0, 256, %s364_s16, %s1518_s19, %s1755_s26, %s1755_s26, %s1754_s8  }
  0x91 PF: > { %375 = sbr.rel (%p1470_p12) target bundleno = 212 (0xd4), region = 40  ;;  %s1557_s17 = sand.u32 (!%p1470_p12), 1, %s1222_s25  }
  0x92   : > { %s749_s11 = sshll.u32 (!%p1470_p12), %s1557_s17, 5  ;;  %s378_s24 = scalar_lea.sflag (!%p1470_p12), [#allocation3], %s1557_s17 }
  0x93   : > { %s381_s14 = scalar_lea.vmem (!%p1470_p12), [#allocation2], %s749_s11  ;;  %p1756_p8 = scmp.ne.s32.totalorder (!%p1470_p12), %s1730_s15, 0 }
  0x96   : > { %1149 = dma.done.wait (%p1756_p8), %s378_s24, 512  }
  0x97   : > { %1151 = vsyncadd (%p1756_p8), %s378_s24, 4294966784  ;;  %s1757_s13 = sld [smem:[#allocation23_spill]]  ;;  %s386_s2 = sand.u32 1, %s1369_s7  }
  0x98   : > { %s1758_s19 = sld [smem:[#allocation32_spill]]  ;;  %s387_s22 = scalar_lea.sflag [#allocation6], %s386_s2 }
  0x9d   : > { %s388_s18 = sand.u32 1, %s1757_s13  }
  0x9e   : > { %s750_s9 = sshll.u32 %s388_s18, 5  ;;  %p1759_p3 = scmp.ne.s32.totalorder %s1758_s19, 0 }
  0x9f   : > { %s390_s21 = scalar_lea.vmem [#allocation5], %s750_s9 }
  0xa0   : > { %1153 = dma.done.wait (%p1759_p3), %s387_s22, 512  }
  0xa1   : > { %1155 = vsyncadd (%p1759_p3), %s387_s22, 4294966784 }
  0xa2   : > { %1157 = dma.done.wait (%p71_p6), [#allocation6], 256  }
  0xa3   : > { %1159 = vsyncadd (%p71_p6), [#allocation6], 4294967040  ;;  %s1760_s16 = sld [smem:[#allocation21_spill]]  ;;  %s400_s5 = scalar_lea.sflag [#allocation9], %s386_s2 }
  0xa4   : > { %s1761_s28 = sld [smem:[#allocation34_spill]] }
  0xa9   : > { %s401_s27 = sand.u32 1, %s1760_s16  }
  0xaa   : > { %s1576_s12 = sshll.u32 %s401_s27, 4  ;;  %p1762_p12 = scmp.ne.s32.totalorder %s1761_s28, 0 }
  0xab   : > { %s403_s20 = scalar_lea.vmem [#allocation8], %s1576_s12 }
  0xac   : > { %1161 = dma.done.wait (%p1762_p12), %s400_s5, 256  }
  0xad   : > { %1163 = vsyncadd (%p1762_p12), %s400_s5, 4294967040  ;;  %s753_s0 = sshll.u32 %s1557_s17, 4 }
  0xae   : > { %s1586_s7 = scalar_lea.vmem [#allocation10], %s753_s0 }
  0xaf   : > { %1165 = dma.done.wait (%p1756_p8), %s400_s5, 256  }
  0xb0   : > { %1167 = vsyncadd (%p1756_p8), %s400_s5, 4294967040  ;;  %v763_v0 = vld [vmem:[%s381_s14] sm:$0xff]   ;;  %v794_v1 = vld [vmem:[%s381_s14 + $0x8] sm:$0xff]   ;;  %s1763_s10 = sld [smem:[#allocation27_spill]]  ;;  %v1264_v14 = vmov 1935823168   ;;  %v1182_v17 = vlaneseq }
  0xb1   : > { %v795_v2 = vld [vmem:[%s381_s14 + $0x10] sm:$0xff]   ;;  %v796_v3 = vld [vmem:[%s381_s14 + $0x18] sm:$0xff]   ;;  %v779_v4 = vld [vmem:[%s390_s21] sm:$0xff]   ;;  %s1764_s15 = sld [smem:[#allocation26_spill]]  ;;  %v1180_v15 = vunpack.c.l.s4 %v1264_v14  ;;  %s453_s24 = scalar_lea.vmem [#allocation11], %s753_s0 }
  0xb2   : > { %v797_v5 = vld [vmem:[%s390_s21 + $0x8] sm:$0xff]   ;;  %v798_v6 = vld [vmem:[%s390_s21 + $0x10] sm:$0xff]   ;;  %v799_v7 = vld [vmem:[%s390_s21 + $0x18] sm:$0xff]   ;;  %1172 = vmul.bf16.f32.vacc0 %v779_v4, %v763_v0  ;;  %v1183_v18 = vshrl.u32 %v1182_v17, 7  ;;  %s1765_s11 = sld [smem:[#allocation35_spill]]  ;;  %s544_s14 = sshll.u32 %s453_s24, 4  ;;  %s1602_s14 = int_to_ptr.vmem [resolvable:$true] %s544_s14 }
  0xb3   : > { %1173 = vmac.bf16.f32.vacc0 %v797_v5, %v794_v1  ;;  %v506_v8 = vld [vmem:[#allocation7] sm:$0xff]  ;;  %v1181_v16 = vunpack.c.0.s8 %v1180_v15  ;;  %v507_v25 = vld [vmem:[#allocation7 + $0x8] sm:$0xff]  ;;  %s1766_s18 = sld [smem:[#allocation40_spill]]  ;;  %s527_s21 = scalar_lea.sflag [#allocation4], %s1557_s17 }
  0xb4   : > { %1174 = vmac.bf16.f32.vacc0 %v798_v6, %v795_v2  ;;  %v512_v9 = vld [vmem:[%s403_s20] sm:$0xff]  ;;  %v513_v26 = vld [vmem:[%s403_s20 + $0x8] sm:$0xff]  ;;  %s1066_s16 = scalar_lea.vmem %s1602_s14, 256  ;;  %s1265_s28 = smov [#allocation11]  }
  0xb5   : > { %1175 = vmac.bf16.f32.vacc0 %v799_v7, %v796_v3  ;;  %v1184_v19 = vsub.s32 %v1181_v16, %v1183_v18  ;;  %v518_v22 = vld [vmem:[%s1586_s7] sm:$0xff]  ;;  %v514_v24 = vmul.f32 0.15, %v512_v9  ;;  %v519_v29 = vld [vmem:[%s1586_s7 + $0x8] sm:$0xff]  ;;  %v515_v31 = vmul.f32 0.15, %v513_v26  ;;  %p1067_p6 = scmp.ne.s32.totalorder %s1602_s14, %s1066_s16 }
  0xb6   : > { %s802_s3 = smul.u32 6, %s1763_s10  ;;  %v520_v28 = vmul.f32 0.031622775, %v518_v22  ;;  %v521_v34 = vmul.f32 0.031622775, %v519_v29  ;;  %s1070_s27 = sshll.u32 %s1265_s28, 4  ;;  %s1071_s27 = int_to_ptr.vmem [resolvable:$false] %s1070_s27 }
  0xb7   : > { %v1176_v10 = vmovacc.add.low.vacc0  ;;  %s756_s8 = sshll.u32 %s1764_s15, 1  ;;  %s1072_s12 = scalar_lea.vmem %s1071_s27, 512 }
  0xb8   : > { %v1177_v11 = vmovacc.add.high.vacc0  ;;  %s541_s26 = sadd.s32 %s802_s3, %s756_s8  ;;  %p1768_p9 = scmp.ne.s32.totalorder %s1765_s11, 0 }
  0xb9   : > { %s757_s13 = sshll.u32 %s541_s26, 7  ;;  %s1767_s9 = smov %s1766_s18 }
  0xba   : > { %v1178_v12 = vcombine.low %v1176_v10, %v1177_v11  ;;  %v1179_v13 = vcombine.high %v1176_v10, %v1177_v11  ;;  %s1607_s22 = scalar_lea.hbm %s1766_s18, %s757_s13  ;;  %p1068_p2 = pnand %p1067_p6, %p1768_p9 }
  0xbb   : > { %p1073_p5 = scmp.lt.s32.totalorder %s1602_s14, %s1071_s27  ;;  %p1074_p13 = scmp.lt.s32.totalorder %s1072_s12, %s1066_s16 }
  0xbc   : > { %v1185_v20 = vrot.slane %v1178_v12, %v1184_v19  ;;  %v1191_v21 = vrot.slane %v1179_v13, %v1184_v19  ;;  %p1069_p10 = pneg %p1068_p2 }
  0xbd   : > { %p1075_p11 = por %p1074_p13, %p1073_p5 }
  0xbe   : > { %v508_v23 = vmul.f32 %v1185_v20, %v506_v8  ;;  %v509_v30 = vmul.f32 %v1191_v21, %v507_v25 }
  0xbf   : > { %p1076_p0 = pnand %p1075_p11, %p1069_p10 }
  0xc0   : > { %v510_v27 = vmul.f32 0.85, %v508_v23  ;;  %v511_v33 = vmul.f32 0.85, %v509_v30 }
  0xc2   : > { %v516_v32 = vadd.f32 %v514_v24, %v510_v27  ;;  %v517_v36 = vadd.f32 %v515_v31, %v511_v33 }
  0xc4   : > { %v522_v35 = vadd.f32 %v520_v28, %v516_v32  ;;  %v523_v37 = vadd.f32 %v521_v34, %v517_v36 }
  0xc6   : > { %524 = vst [vmem:[%s453_s24] sm:$0xff] %v522_v35  ;;  %525 = vst [vmem:[%s453_s24 + $0x8] sm:$0xff] %v523_v37 }
  0xc7   : > { %1079 = shalt.err (!%p1076_p0)
}
  0xc8   : > { %s1080_s5 = scalar_lea.hbm %s1607_s22, 256  ;;  %s1084_s7 = scalar_lea.hbm %s1767_s9, 1536 }
  0xc9   : > { %p1081_p1 = scmp.ne.s32.totalorder %s1607_s22, %s1080_s5  ;;  %p1085_p8 = scmp.lt.s32.totalorder %s1607_s22, %s1767_s9 }
  0xca   : > { %p1086_p3 = scmp.lt.s32.totalorder %s1084_s7, %s1080_s5 }
  0xcb   : > { %p1082_p4 = pnand %p1081_p1, %p1768_p9 }
  0xcc   : > { %p1087_p12 = por %p1086_p3, %p1085_p8 }
  0xcd   : > { %p1083_p7 = pneg %p1082_p4 }
  0xcf   : > { %p1088_p6 = pnand %p1087_p12, %p1083_p7 }
  0xd1   : > { %1091 = shalt.err (!%p1088_p6)
}
  0xd2   : > { %s1266_s3 = smov 128   ;;  %s1267_s8 = smov 8  }
  0xd3   : > { %822 = dma.vmem_to_hbm [thread:$0]  (%p1768_p9), %s1602_s14, 256, %s1607_s22, %s527_s21, %s1266_s3, %s1266_s3, %s1267_s8  }
  0xd4 PF: > { %s1769_s26 = sld [smem:[#allocation24_spill]]  ;;  %p834_p2 = scmp.ge.s32.totalorder %s1246_s6, 2 }
  0xd5   : > { %s1770_s24 = sld [smem:[#allocation36_spill]] }
  0xda   : > { %s559_s13 = sand.u32 1, %s1769_s26  }
  0xdb   : > { %p1771_p10 = scmp.ne.s32.totalorder %s1770_s24, 0  ;;  %s560_s19 = scalar_lea.sflag [#allocation4], %s559_s13 }
  0xdd   : > { %p829_p5 = pnand %p834_p2, %p1771_p10 }
  0xdf   : > { %p830_p13 = pneg %p829_p5 }
  0xe1   : > { %1169 = dma.done.wait (%p830_p13), %s560_s19, 256  }
  0xe2   : > { %1171 = vsyncadd (%p830_p13), %s560_s19, 4294967040  ;;  %s27_s6 = sadd.s32 1, %s1246_s6   ;;  %s1773_s18 = sld [smem:[#allocation21_spill]] }
  0xe3   : > { %p1637_p11 = scmp.ge.s32.totalorder %s27_s6, 8   ;;  %s1774_s19 = sld [smem:[#allocation22_spill]] }
  0xe4   : > { %s1775_s20 = sld [smem:[#allocation33_spill]]  ;;  %s1782_s22 = smov %s1214_s23 }
  0xe5   : > { %s1776_s21 = sld [smem:[#allocation23_spill]]  ;;  %s1784_s24 = smov %s1222_s25 }
  0xe6   : > { %s1777_s17 = sld [smem:[#allocation30_spill]]  ;;  %s1786_s27 = smov %s1238_s29 }
  0xe7   : > { %s1778_s11 = sld [smem:[#allocation25_spill]]  ;;  %s1787_s28 = smov %s1242_s30 }
  0xe8   : > { %s1779_s26 = sld [smem:[#allocation31_spill]] }
  0xe9   : > { %s1780_s14 = sld [smem:[#allocation28_spill]] }
  0xea   : > { %s1781_s16 = sld [smem:[#allocation29_spill]] }
  0xec   : > { %s1783_s23 = smov %s1777_s17  ;;  %26 = sbr.rel (!%p1637_p11) target bundleno = 19 (0x13), region = 132 }
  0xed   : > { %s1785_s25 = smov %s1778_s11 }
  0xef   : > { %s1788_s29 = smov %s1780_s14 }
  0xf0   : > { %s1789_s30 = smov %s1781_s16 }
  0xf1   :  { %565 = vsyncpa [#allocation3], 1 }
  0xf2   :  { %567 = vsyncpa [#allocation3 + $0x1], 1 }
  0xf3   :  { %568 = vsyncpa [#allocation6], 1 }
  0xf4   :  { %570 = vsyncpa [#allocation6 + $0x1], 1 }
  0xf5   :  { %571 = vsyncpa [#allocation9], 1 }
  0xf6   :  { %573 = vsyncpa [#allocation9 + $0x1], 1 }
  0xf7   :  { %574 = vsyncpa [#allocation4], 1 }
  0xf8   :  { %576 = vsyncpa [#allocation4 + $0x1], 1 }

</bundles_post_ra>
